<compile_context>
chip_gen: v7x
topology: tpu7x:2x2x1
jax: 0.10.0
libtpu: 0.0.40
codegen_flags: <defaults>
</compile_context>

<pallas_src>
import jax
import jax.numpy as jnp
from jax import lax
from jax.experimental import pallas as pl
from jax.experimental.pallas import tpu as pltpu


LANE = 128            # pad feature dims to multiples of the 128-lane vreg
SUBLANE = 16          # bf16 sublane packing -> pad row counts to mult. of 16
MERGE_ROW_TILE = 2048  # kernel A row tile (amortizes ~0.35us per-step cost)
GCN_TN = 1024          # kernel B output-row tile
GCN_TK = 2048          # kernel B reduction tile (A_hat tile = 4 MiB bf16)
                       # (on v7x, sweep GCN_TK up to 4096 with a higher
                       #  vmem_limit; keep total well under 64 MiB)


def _round_up(n: int, m: int) -> int:
    return ((n + m - 1) // m) * m


def _pad2d(x, rows, cols, dtype=None):
    """Zero-pad a 2D array to (rows, cols), optionally casting dtype."""
    dtype = dtype or x.dtype
    r, c = x.shape
    out = jnp.zeros((rows, cols), dtype)
    if r == 0 or c == 0:
        return out
    return out.at[:r, :c].set(x.astype(dtype))


# --------------------------------------------------------------------------
# Kernel A: merged per-table stage (single launch, scalar-prefetch table ids)
#   ReLU(X @ W1 + b1) -> (concat extra via split W2) -> LayerNorm -> ReLU -> @Wg
# --------------------------------------------------------------------------
def _make_merged_table_kernel(d_graph_true: int, has_extra: bool):
    def kernel(tid_ref, *refs):          # tid_ref: SMEM scalar-prefetch (unused
        del tid_ref                      # in the body; used by the index_maps)
        if has_extra:
            (x_ref, e_ref, w1_ref, b1_ref, w2a_ref, w2b_ref,
             b2_ref, g_ref, beta_ref, wg_ref, o_ref) = refs
        else:
            (x_ref, w1_ref, b1_ref, w2a_ref,
             b2_ref, g_ref, beta_ref, wg_ref, o_ref) = refs

        # TableEncoder: ReLU(X @ W1 + b1), f32 accumulation on the MXU.
        h1 = jnp.dot(x_ref[...], w1_ref[...], preferred_element_type=jnp.float32)
        h1 = jnp.maximum(h1 + b1_ref[...], 0.0)

        # lin_dict Linear on [encoder_out | extra_embed] via split weights
        # (avoids materializing the feature concat).
        h2 = jnp.dot(h1.astype(jnp.bfloat16), w2a_ref[...],
                     preferred_element_type=jnp.float32)
        if has_extra:
            h2 = h2 + jnp.dot(e_ref[...], w2b_ref[...],
                              preferred_element_type=jnp.float32)
        h2 = h2 + b2_ref[...]

        # LayerNorm over the TRUE graph_dim.  Padded columns of W2/b2 are
        # exact zeros, so padded columns of h2 are exact zeros and
        # E[x], E[x^2] need no mask (var = E[x^2] - mu^2).
        inv_d = 1.0 / float(d_graph_true)
        mu = jnp.sum(h2, axis=-1, keepdims=True) * inv_d
        ex2 = jnp.sum(h2 * h2, axis=-1, keepdims=True) * inv_d
        var = ex2 - mu * mu
        hn = (h2 - mu) * lax.rsqrt(var + 1e-5)         # PyTorch LayerNorm eps
        hn = hn * g_ref[...] + beta_ref[...]            # padded gamma/beta = 0
        h3 = jnp.maximum(hn, 0.0)                       # ReLU; Dropout(eval)=id

        # Fused graph-encoder input projection: Wg is shared across tables, so
        # concat_t(h3_t) @ Wg == concat_t(h3_t @ Wg).  Output bf16 (GCN input).
        o_ref[...] = jnp.dot(h3.astype(jnp.bfloat16), wg_ref[...],
                             preferred_element_type=jnp.float32
                             ).astype(o_ref.dtype)
    return kernel


def _merge_row_tile(max_rows, f_pad, e_pad, g_pad, enc_pad):
    """Pick the kernel-A row tile: as large as possible (amortize grid-step
    overhead) while keeping double-buffered tiles + f32 temps ~<= 24 MiB."""
    per_row = 4 * (f_pad + e_pad + g_pad) + 16 * max(enc_pad, g_pad)
    cap = max(SUBLANE, ((24 << 20) // per_row) // SUBLANE * SUBLANE)
    tm = min(MERGE_ROW_TILE, cap)
    if max_rows < tm:
        tm = _round_up(max_rows, SUBLANE)
    return tm


def fused_tables_forward(table_dict, non_table_dict, p_enc_dict, p_lin_dict,
                         wg, graph_dim):
    """All tables in ONE pallas_call.  Rows are stacked (each table padded to
    a multiple of the row tile); a scalar-prefetched per-block table id selects
    the per-table weights in the index_maps.  Returns the compact
    (num_nodes, g_pad) bf16 slab of X @ Wg (node order = table_dict order)."""
    order = list(table_dict.keys())
    enc_dim = p_enc_dict[order[0]]["w"].shape[1]

    f_true = {t: table_dict[t].shape[1] for t in order}
    rows = {t: table_dict[t].shape[0] for t in order}
    f_pad_max = _round_up(max(f_true.values()), LANE)
    enc_pad = _round_up(enc_dim, LANE)
    g_pad = _round_up(graph_dim, LANE)

    extra_true = {}
    if non_table_dict is not None:
        for t in order:
            if t in non_table_dict and non_table_dict[t].size != 0:
                extra_true[t] = non_table_dict[t].shape[1]
    has_extra = len(extra_true) > 0
    e_pad_max = _round_up(max(extra_true.values()), LANE) if has_extra else 0

    tm = _merge_row_tile(max(rows.values()), f_pad_max, e_pad_max, g_pad,
                         enc_pad)
    nblk = {t: -(-rows[t] // tm) for t in order}
    pad_rows = {t: nblk[t] * tm for t in order}
    total_blocks = sum(nblk.values())
    total_pad_rows = total_blocks * tm

    # Stacked row inputs (bf16) + per-block table id (scalar prefetch, SMEM).
    x_all = jnp.zeros((total_pad_rows, f_pad_max), jnp.bfloat16)
    e_all = (jnp.zeros((total_pad_rows, e_pad_max), jnp.bfloat16)
             if has_extra else None)
    tid_list, pad_off, off = [], {}, 0
    for ti, t in enumerate(order):
        pad_off[t] = off
        x_all = x_all.at[off:off + rows[t], :f_true[t]].set(
            table_dict[t].astype(jnp.bfloat16))
        if has_extra and t in extra_true:
            e_all = e_all.at[off:off + rows[t], :extra_true[t]].set(
                non_table_dict[t].astype(jnp.bfloat16))
        tid_list += [ti] * nblk[t]
        off += pad_rows[t]
    tid = jnp.asarray(tid_list, jnp.int32)

    # Stacked per-table parameters (bf16 weights, f32 bias/LN, padded cols 0).
    w1_all = jnp.stack([_pad2d(p_enc_dict[t]["w"], f_pad_max, enc_pad,
                               jnp.bfloat16) for t in order])
    b1_all = jnp.stack([_pad2d(p_enc_dict[t]["b"], 1, enc_pad, jnp.float32)
                        for t in order])
    w2a_all = jnp.stack([_pad2d(p_lin_dict[t]["w"][:enc_dim], enc_pad, g_pad,
                                jnp.bfloat16) for t in order])
    if has_extra:
        w2b_all = jnp.stack([_pad2d(p_lin_dict[t]["w"][enc_dim:], e_pad_max,
                                    g_pad, jnp.bfloat16) for t in order])
    b2_all = jnp.stack([_pad2d(p_lin_dict[t]["b"], 1, g_pad, jnp.float32)
                        for t in order])
    gam_all = jnp.stack([_pad2d(p_lin_dict[t]["gamma"], 1, g_pad, jnp.float32)
                         for t in order])
    bet_all = jnp.stack([_pad2d(p_lin_dict[t]["beta"], 1, g_pad, jnp.float32)
                         for t in order])
    wg_p = _pad2d(wg, g_pad, g_pad, jnp.bfloat16)

    def row_spec(cols):        # streamed per row block
        return pl.BlockSpec((tm, cols), lambda i, tid_r: (i, 0))

    def tbl_spec(r, c):        # per-table weight block selected by table id
        return pl.BlockSpec((None, r, c), lambda i, tid_r: (tid_r[i], 0, 0))

    operands = [x_all]
    in_specs = [row_spec(f_pad_max)]
    if has_extra:
        operands.append(e_all)
        in_specs.append(row_spec(e_pad_max))
    operands += [w1_all, b1_all, w2a_all]
    in_specs += [tbl_spec(f_pad_max, enc_pad), tbl_spec(1, enc_pad),
                 tbl_spec(enc_pad, g_pad)]
    if has_extra:
        operands.append(w2b_all)
        in_specs.append(tbl_spec(e_pad_max, g_pad))
    operands += [b2_all, gam_all, bet_all, wg_p]
    in_specs += [tbl_spec(1, g_pad), tbl_spec(1, g_pad), tbl_spec(1, g_pad),
                 pl.BlockSpec((g_pad, g_pad), lambda i, tid_r: (0, 0))]

    # VMEM sizing: double-buffered bf16 x/e/out tiles + f32 temporaries +
    # double-buffered per-table weights (all <= ~10 MiB at tm=2048, g_pad=128).
    need = tm * (4 * (f_pad_max + e_pad_max + g_pad)
                 + 16 * max(enc_pad, g_pad))
    need += 4 * (f_pad_max * enc_pad + enc_pad * g_pad
                 + e_pad_max * g_pad + g_pad * g_pad) * 2
    vmem_limit_a = min(need + (8 << 20), 96 << 20)

    out = pl.pallas_call(
        _make_merged_table_kernel(graph_dim, has_extra),
        out_shape=jax.ShapeDtypeStruct((total_pad_rows, g_pad), jnp.bfloat16),
        grid_spec=pltpu.PrefetchScalarGridSpec(
            num_scalar_prefetch=1,
            grid=(total_blocks,),
            in_specs=in_specs,
            out_specs=pl.BlockSpec((tm, g_pad), lambda i, tid_r: (i, 0))),
        compiler_params=pltpu.CompilerParams(
            dimension_semantics=("parallel",),
            vmem_limit_bytes=int(vmem_limit_a)),
    )(tid, *operands)

    # Compact away the per-table row padding (single cheap pass; see TODO at
    # top about writing into a compact buffer directly from the kernel).
    parts = [out[pad_off[t]:pad_off[t] + rows[t]] for t in order]
    return jnp.concatenate(parts, axis=0) if len(parts) > 1 else parts[0]


# --------------------------------------------------------------------------
# Kernel B: GCN aggregation  out = ReLU( deg_inv * ((A+I) @ XW) + bg )
#   (A+I) counts streamed as (tn, tk) bf16 tiles over a K-reduction grid axis;
#   accumulate directly into the resident f32 output block; apply the exact
#   f32 1/deg row scale + bias + ReLU at the k==last finalize.
# --------------------------------------------------------------------------
def _gcn_kernel(a_ref, xw_ref, dinv_ref, b_ref, o_ref):
    k = pl.program_id(1)

    @pl.when(k == 0)
    def _():
        o_ref[...] = jnp.zeros_like(o_ref)

    o_ref[...] += jnp.dot(a_ref[...], xw_ref[...],
                          preferred_element_type=jnp.float32)

    @pl.when(k == pl.num_programs(1) - 1)
    def _():
        o_ref[...] = jnp.maximum(o_ref[...] * dinv_ref[...] + b_ref[...], 0.0)


def _gcn_padding(num_nodes):
    """Return (n_pad, tn, tk) with n_pad % tn == 0 and n_pad % tk == 0."""
    if num_nodes <= GCN_TK:
        n_pad = _round_up(num_nodes, SUBLANE)
        return n_pad, n_pad, n_pad
    n_pad = _round_up(num_nodes, GCN_TK)
    return n_pad, GCN_TN, GCN_TK


def gcn_encode(a_counts, xw_pad, deg_inv, b, g_pad, tn, tk):
    n_pad = a_counts.shape[0]
    b_p = _pad2d(b, 1, g_pad, jnp.float32)

    # VMEM: dbl-buffered A tile + XW tile + dbl-buffered f32 out + small bits.
    need = 2 * (tn * tk * 2 + tk * g_pad * 2 + tn * 4 + g_pad * 4) \
        + 2 * tn * g_pad * 4
    vmem_limit_b = min(need + (8 << 20), 96 << 20)

    return pl.pallas_call(
        _gcn_kernel,
        out_shape=jax.ShapeDtypeStruct((n_pad, g_pad), jnp.float32),
        grid=(n_pad // tn, n_pad // tk),
        in_specs=[
            pl.BlockSpec((tn, tk), lambda i, k: (i, k)),     # stream (A+I)
            pl.BlockSpec((tk, g_pad), lambda i, k: (k, 0)),  # XW k-tile
            pl.BlockSpec((tn, 1), lambda i, k: (i, 0)),      # 1/deg row scale
            pl.BlockSpec((1, g_pad), lambda i, k: (0, 0)),   # resident bias
        ],
        out_specs=pl.BlockSpec((tn, g_pad), lambda i, k: (i, 0)),
        compiler_params=pltpu.CompilerParams(
            dimension_semantics=("parallel", "arbitrary"),
            vmem_limit_bytes=int(vmem_limit_b)),
    )(a_counts, xw_pad, deg_inv, b_p)


# --------------------------------------------------------------------------
# Glue (plain JAX): adjacency construction, parameter init, forward driver
# --------------------------------------------------------------------------
def build_adj_counts(edge_index, num_nodes, pad_to):
    """Unnormalized (A + I) counts built directly in bf16 (small-integer
    counts are exact in bf16 up to 256), plus the exact f32 per-row 1/deg.
    NOTE: duplicate edges double-count via scatter-add (as documented)."""
    src, dst = edge_index[0], edge_index[1]
    a = jnp.zeros((pad_to, pad_to), jnp.bfloat16)
    a = a.at[dst, src].add(1.0)                          # message src -> dst
    ids = jnp.arange(num_nodes)
    a = a.at[ids, ids].add(1.0)                          # self loops (real)
    deg = jnp.zeros((pad_to, 1), jnp.float32)
    deg = deg.at[dst, 0].add(1.0)
    deg = deg.at[ids, 0].add(1.0)
    deg_inv = 1.0 / jnp.maximum(deg, 1.0)                # padded rows -> 1
    return a, deg_inv


def init_params(key, table_feat_dims, enc_dim, lin_in_dims, graph_dim):
    params = {"table_enc": {}, "lin": {}}
    for t, d_in in table_feat_dims.items():
        key, k1, k2 = jax.random.split(key, 3)
        params["table_enc"][t] = {
            "w": 0.1 * jax.random.normal(k1, (d_in, enc_dim), jnp.float32),
            "b": 0.1 * jax.random.normal(k2, (1, enc_dim), jnp.float32),
        }
    for t, d_in in lin_in_dims.items():
        key, k1, k2 = jax.random.split(key, 3)
        params["lin"][t] = {
            "w": 0.1 * jax.random.normal(k1, (d_in, graph_dim), jnp.float32),
            "b": 0.1 * jax.random.normal(k2, (1, graph_dim), jnp.float32),
            "gamma": jnp.ones((1, graph_dim), jnp.float32),
            "beta": jnp.zeros((1, graph_dim), jnp.float32),
        }
    key, k1, k2 = jax.random.split(key, 3)
    params["graph"] = {
        "w": 0.1 * jax.random.normal(k1, (graph_dim, graph_dim), jnp.float32),
        "b": 0.1 * jax.random.normal(k2, (1, graph_dim), jnp.float32),
    }
    return params


def multi_table_bridge_forward(params, table_dict, non_table_dict, edge_index,
                               target_table, graph_dim):
    target_l = table_dict[target_table].shape[0]
    g_pad = _round_up(graph_dim, LANE)

    # Stage 1: one merged Pallas launch over all tables (encoder + concat-via-
    # split-weights + Linear/LayerNorm/ReLU + Wg projection) -> XW slab.
    xw = fused_tables_forward(table_dict, non_table_dict,
                              params["table_enc"], params["lin"],
                              params["graph"]["w"], graph_dim)

    num_nodes = xw.shape[0]
    n_pad, tn, tk = _gcn_padding(num_nodes)
    xw_p = jnp.zeros((n_pad, g_pad), jnp.bfloat16).at[:num_nodes].set(xw)
    a_counts, deg_inv = build_adj_counts(edge_index, num_nodes, n_pad)

    # Stage 2: GCN aggregation (Pallas kernel B).
    node_feats = gcn_encode(a_counts, xw_p, deg_inv, params["graph"]["b"],
                            g_pad, tn, tk)

    # F.dropout in eval mode = identity; slice target rows / true feature dim.
    return node_feats[:target_l, :graph_dim]


# --------------------------------------------------------------------------
if __name__ == "__main__":
    key = jax.random.PRNGKey(0)

    # Small synthetic setup: two tables, "users" is the target table.
    n_users, n_items = 8, 10
    feat_users, feat_items = 12, 6
    enc_dim = 16
    extra_dim = 4          # non-table embedding concatenated to "items"
    graph_dim = 32
    target_table = "users"

    key, ku, ki, ke = jax.random.split(key, 4)
    table_dict = {
        "users": jax.random.normal(ku, (n_users, feat_users), jnp.float32),
        "items": jax.random.normal(ki, (n_items, feat_items), jnp.float32),
    }
    non_table_dict = {
        "items": jax.random.normal(ke, (n_items, extra_dim), jnp.float32),
    }

    # lin_dict input dims after feature-concat.
    lin_in_dims = {"users": enc_dim, "items": enc_dim + extra_dim}
    table_feat_dims = {"users": feat_users, "items": feat_items}

    # Deterministic bipartite edges (global ids: users 0..7, items 8..17).
    src, dst = [], []
    for u in range(n_users):
        it = n_users + (u % n_items)
        src += [u, it]
        dst += [it, u]
    for i in range(n_items):
        u = i % n_users
        src += [n_users + i]
        dst += [u]
    edge_index = jnp.array([src, dst], dtype=jnp.int32)   # (2, E)

    key, kp = jax.random.split(key)
    params = init_params(kp, table_feat_dims, enc_dim, lin_in_dims, graph_dim)

    out = multi_table_bridge_forward(params, table_dict, non_table_dict,
                                     edge_index, target_table, graph_dim)
    out = jax.block_until_ready(out)

    assert out.shape == (n_users, graph_dim), out.shape
    assert bool(jnp.all(jnp.isfinite(out)))
    print("KERNEL_OK")
</pallas_src>

<mosaic_0001>
module attributes {stable_mosaic.version = 11 : i64} {
  func.func @kernel(%arg0: i32, %arg1: memref<2xi32, #tpu.memory_space<smem>>, %arg2: memref<16x128xbf16, #tpu.memory_space<vmem>>, %arg3: memref<16x128xbf16, #tpu.memory_space<vmem>>, %arg4: memref<1x128x128xbf16, #tpu.memory_space<vmem>>, %arg5: memref<1x1x128xf32, #tpu.memory_space<vmem>>, %arg6: memref<1x128x128xbf16, #tpu.memory_space<vmem>>, %arg7: memref<1x128x128xbf16, #tpu.memory_space<vmem>>, %arg8: memref<1x1x128xf32, #tpu.memory_space<vmem>>, %arg9: memref<1x1x128xf32, #tpu.memory_space<vmem>>, %arg10: memref<1x1x128xf32, #tpu.memory_space<vmem>>, %arg11: memref<128x128xbf16, #tpu.memory_space<vmem>>, %arg12: memref<16x128xbf16, #tpu.memory_space<vmem>>) attributes {dimension_semantics = [#tpu.dimension_semantics<parallel>], iteration_bounds = array<i64: 2>, scalar_prefetch = 1 : i64, scratch_operands = 0 : i64, tpu.core_type = #tpu.core_type<tc>, window_params = [{transform_indices = @transform_0, window_bounds = array<i64: 16, 128>}, {transform_indices = @transform_1, window_bounds = array<i64: 16, 128>}, {transform_indices = @transform_2, window_bounds = array<i64: 1, 128, 128>}, {transform_indices = @transform_3, window_bounds = array<i64: 1, 1, 128>}, {transform_indices = @transform_4, window_bounds = array<i64: 1, 128, 128>}, {transform_indices = @transform_5, window_bounds = array<i64: 1, 128, 128>}, {transform_indices = @transform_6, window_bounds = array<i64: 1, 1, 128>}, {transform_indices = @transform_7, window_bounds = array<i64: 1, 1, 128>}, {transform_indices = @transform_8, window_bounds = array<i64: 1, 1, 128>}, {pipeline_mode = #tpu.pipeline_mode<synchronous>, transform_indices = @transform_9, window_bounds = array<i64: 128, 128>}, {transform_indices = @transform_10, window_bounds = array<i64: 16, 128>}]} {
    %c0 = arith.constant 0 : index
    %c0_0 = arith.constant 0 : index
    %0 = vector.load %arg2[%c0, %c0_0] : memref<16x128xbf16, #tpu.memory_space<vmem>>, vector<16x128xbf16>
    %c0_1 = arith.constant 0 : index
    %c0_2 = arith.constant 0 : index
    %c0_3 = arith.constant 0 : index
    %1 = vector.load %arg4[%c0_1, %c0_2, %c0_3] : memref<1x128x128xbf16, #tpu.memory_space<vmem>>, vector<1x128x128xbf16>
    %2 = vector.shape_cast %1 : vector<1x128x128xbf16> to vector<128x128xbf16>
    %cst = arith.constant dense<0.000000e+00> : vector<16x128xf32>
    %3 = tpu.matmul %0, %2, %cst {dimension_numbers = #tpu.dot_dimension_numbers<[1], [0], [0], [1], [0, 0, 1, 1], [], []>} : vector<16x128xbf16>, vector<128x128xbf16>, vector<16x128xf32> -> vector<16x128xf32>
    %c0_4 = arith.constant 0 : index
    %c0_5 = arith.constant 0 : index
    %c0_6 = arith.constant 0 : index
    %4 = vector.load %arg5[%c0_4, %c0_5, %c0_6] : memref<1x1x128xf32, #tpu.memory_space<vmem>>, vector<1x1x128xf32>
    %5 = vector.shape_cast %4 : vector<1x1x128xf32> to vector<1x128xf32>
    %6 = vector.broadcast %5 : vector<1x128xf32> to vector<16x128xf32>
    %7 = arith.addf %3, %6 : vector<16x128xf32>
    %cst_7 = arith.constant 0.000000e+00 : f32
    %8 = vector.broadcast %cst_7 : f32 to vector<16x128xf32>
    %9 = arith.maximumf %7, %8 : vector<16x128xf32>
    %10 = arith.truncf %9 : vector<16x128xf32> to vector<16x128xbf16>
    %c0_8 = arith.constant 0 : index
    %c0_9 = arith.constant 0 : index
    %c0_10 = arith.constant 0 : index
    %11 = vector.load %arg6[%c0_8, %c0_9, %c0_10] : memref<1x128x128xbf16, #tpu.memory_space<vmem>>, vector<1x128x128xbf16>
    %12 = vector.shape_cast %11 : vector<1x128x128xbf16> to vector<128x128xbf16>
    %cst_11 = arith.constant dense<0.000000e+00> : vector<16x128xf32>
    %13 = tpu.matmul %10, %12, %cst_11 {dimension_numbers = #tpu.dot_dimension_numbers<[1], [0], [0], [1], [0, 0, 1, 1], [], []>} : vector<16x128xbf16>, vector<128x128xbf16>, vector<16x128xf32> -> vector<16x128xf32>
    %c0_12 = arith.constant 0 : index
    %c0_13 = arith.constant 0 : index
    %14 = vector.load %arg3[%c0_12, %c0_13] : memref<16x128xbf16, #tpu.memory_space<vmem>>, vector<16x128xbf16>
    %c0_14 = arith.constant 0 : index
    %c0_15 = arith.constant 0 : index
    %c0_16 = arith.constant 0 : index
    %15 = vector.load %arg7[%c0_14, %c0_15, %c0_16] : memref<1x128x128xbf16, #tpu.memory_space<vmem>>, vector<1x128x128xbf16>
    %16 = vector.shape_cast %15 : vector<1x128x128xbf16> to vector<128x128xbf16>
    %cst_17 = arith.constant dense<0.000000e+00> : vector<16x128xf32>
    %17 = tpu.matmul %14, %16, %cst_17 {dimension_numbers = #tpu.dot_dimension_numbers<[1], [0], [0], [1], [0, 0, 1, 1], [], []>} : vector<16x128xbf16>, vector<128x128xbf16>, vector<16x128xf32> -> vector<16x128xf32>
    %18 = arith.addf %13, %17 : vector<16x128xf32>
    %c0_18 = arith.constant 0 : index
    %c0_19 = arith.constant 0 : index
    %c0_20 = arith.constant 0 : index
    %19 = vector.load %arg8[%c0_18, %c0_19, %c0_20] : memref<1x1x128xf32, #tpu.memory_space<vmem>>, vector<1x1x128xf32>
    %20 = vector.shape_cast %19 : vector<1x1x128xf32> to vector<1x128xf32>
    %21 = vector.broadcast %20 : vector<1x128xf32> to vector<16x128xf32>
    %22 = arith.addf %18, %21 : vector<16x128xf32>
    %cst_21 = arith.constant dense<0.000000e+00> : vector<16xf32>
    %23 = vector.multi_reduction <add>, %22, %cst_21 [1] : vector<16x128xf32> to vector<16xf32>
    %24 = vector.shape_cast %23 : vector<16xf32> to vector<16x1xf32>
    %cst_22 = arith.constant 3.125000e-02 : f32
    %25 = vector.broadcast %cst_22 : f32 to vector<16x1xf32>
    %26 = arith.mulf %24, %25 : vector<16x1xf32>
    %27 = arith.mulf %22, %22 : vector<16x128xf32>
    %cst_23 = arith.constant dense<0.000000e+00> : vector<16xf32>
    %28 = vector.multi_reduction <add>, %27, %cst_23 [1] : vector<16x128xf32> to vector<16xf32>
    %29 = vector.shape_cast %28 : vector<16xf32> to vector<16x1xf32>
    %cst_24 = arith.constant 3.125000e-02 : f32
    %30 = vector.broadcast %cst_24 : f32 to vector<16x1xf32>
    %31 = arith.mulf %29, %30 : vector<16x1xf32>
    %32 = arith.mulf %26, %26 : vector<16x1xf32>
    %33 = arith.subf %31, %32 : vector<16x1xf32>
    %34 = vector.broadcast %26 : vector<16x1xf32> to vector<16x128xf32>
    %35 = arith.subf %22, %34 : vector<16x128xf32>
    %cst_25 = arith.constant 9.99999974E-6 : f32
    %36 = vector.broadcast %cst_25 : f32 to vector<16x1xf32>
    %37 = arith.addf %33, %36 : vector<16x1xf32>
    %38 = math.rsqrt %37 : vector<16x1xf32>
    %39 = vector.broadcast %38 : vector<16x1xf32> to vector<16x128xf32>
    %40 = arith.mulf %35, %39 : vector<16x128xf32>
    %c0_26 = arith.constant 0 : index
    %c0_27 = arith.constant 0 : index
    %c0_28 = arith.constant 0 : index
    %41 = vector.load %arg9[%c0_26, %c0_27, %c0_28] : memref<1x1x128xf32, #tpu.memory_space<vmem>>, vector<1x1x128xf32>
    %42 = vector.shape_cast %41 : vector<1x1x128xf32> to vector<1x128xf32>
    %43 = vector.broadcast %42 : vector<1x128xf32> to vector<16x128xf32>
    %44 = arith.mulf %40, %43 : vector<16x128xf32>
    %c0_29 = arith.constant 0 : index
    %c0_30 = arith.constant 0 : index
    %c0_31 = arith.constant 0 : index
    %45 = vector.load %arg10[%c0_29, %c0_30, %c0_31] : memref<1x1x128xf32, #tpu.memory_space<vmem>>, vector<1x1x128xf32>
    %46 = vector.shape_cast %45 : vector<1x1x128xf32> to vector<1x128xf32>
    %47 = vector.broadcast %46 : vector<1x128xf32> to vector<16x128xf32>
    %48 = arith.addf %44, %47 : vector<16x128xf32>
    %cst_32 = arith.constant 0.000000e+00 : f32
    %49 = vector.broadcast %cst_32 : f32 to vector<16x128xf32>
    %50 = arith.maximumf %48, %49 : vector<16x128xf32>
    %51 = arith.truncf %50 : vector<16x128xf32> to vector<16x128xbf16>
    %c0_33 = arith.constant 0 : index
    %c0_34 = arith.constant 0 : index
    %52 = vector.load %arg11[%c0_33, %c0_34] : memref<128x128xbf16, #tpu.memory_space<vmem>>, vector<128x128xbf16>
    %cst_35 = arith.constant dense<0.000000e+00> : vector<16x128xf32>
    %53 = tpu.matmul %51, %52, %cst_35 {dimension_numbers = #tpu.dot_dimension_numbers<[1], [0], [0], [1], [0, 0, 1, 1], [], []>} : vector<16x128xbf16>, vector<128x128xbf16>, vector<16x128xf32> -> vector<16x128xf32>
    %54 = arith.truncf %53 : vector<16x128xf32> to vector<16x128xbf16>
    %c0_36 = arith.constant 0 : index
    %c0_37 = arith.constant 0 : index
    %55 = vector.load %arg12[%c0_36, %c0_37] : memref<16x128xbf16, #tpu.memory_space<vmem>>, vector<16x128xbf16>
    tpu.vector_store %arg12[%c0_36, %c0_37], %54 {strides = array<i32>} : memref<16x128xbf16, #tpu.memory_space<vmem>>, vector<16x128xbf16>,
    return
  }
  func.func @transform_0(%arg0: i32, %arg1: memref<2xi32, #tpu.memory_space<smem>>) -> (i32, i32) {
    %c0_i32 = arith.constant 0 : i32
    %c0_i32_0 = arith.constant 0 : i32
    return %arg0, %c0_i32 : i32, i32
  }
  func.func @transform_1(%arg0: i32, %arg1: memref<2xi32, #tpu.memory_space<smem>>) -> (i32, i32) {
    %c0_i32 = arith.constant 0 : i32
    %c0_i32_0 = arith.constant 0 : i32
    return %arg0, %c0_i32 : i32, i32
  }
  func.func @transform_2(%arg0: i32, %arg1: memref<2xi32, #tpu.memory_space<smem>>) -> (i32, i32, i32) {
    %0 = arith.index_cast %arg0 : i32 to index
    %1 = memref.load %arg1[%0] : memref<2xi32, #tpu.memory_space<smem>>
    %c0_i32 = arith.constant 0 : i32
    %c0_i32_0 = arith.constant 0 : i32
    %c0_i32_1 = arith.constant 0 : i32
    return %1, %c0_i32, %c0_i32_0 : i32, i32, i32
  }
  func.func @transform_3(%arg0: i32, %arg1: memref<2xi32, #tpu.memory_space<smem>>) -> (i32, i32, i32) {
    %0 = arith.index_cast %arg0 : i32 to index
    %1 = memref.load %arg1[%0] : memref<2xi32, #tpu.memory_space<smem>>
    %c0_i32 = arith.constant 0 : i32
    %c0_i32_0 = arith.constant 0 : i32
    %c0_i32_1 = arith.constant 0 : i32
    return %1, %c0_i32, %c0_i32_0 : i32, i32, i32
  }
  func.func @transform_4(%arg0: i32, %arg1: memref<2xi32, #tpu.memory_space<smem>>) -> (i32, i32, i32) {
    %0 = arith.index_cast %arg0 : i32 to index
    %1 = memref.load %arg1[%0] : memref<2xi32, #tpu.memory_space<smem>>
    %c0_i32 = arith.constant 0 : i32
    %c0_i32_0 = arith.constant 0 : i32
    %c0_i32_1 = arith.constant 0 : i32
    return %1, %c0_i32, %c0_i32_0 : i32, i32, i32
  }
  func.func @transform_5(%arg0: i32, %arg1: memref<2xi32, #tpu.memory_space<smem>>) -> (i32, i32, i32) {
    %0 = arith.index_cast %arg0 : i32 to index
    %1 = memref.load %arg1[%0] : memref<2xi32, #tpu.memory_space<smem>>
    %c0_i32 = arith.constant 0 : i32
    %c0_i32_0 = arith.constant 0 : i32
    %c0_i32_1 = arith.constant 0 : i32
    return %1, %c0_i32, %c0_i32_0 : i32, i32, i32
  }
  func.func @transform_6(%arg0: i32, %arg1: memref<2xi32, #tpu.memory_space<smem>>) -> (i32, i32, i32) {
    %0 = arith.index_cast %arg0 : i32 to index
    %1 = memref.load %arg1[%0] : memref<2xi32, #tpu.memory_space<smem>>
    %c0_i32 = arith.constant 0 : i32
    %c0_i32_0 = arith.constant 0 : i32
    %c0_i32_1 = arith.constant 0 : i32
    return %1, %c0_i32, %c0_i32_0 : i32, i32, i32
  }
  func.func @transform_7(%arg0: i32, %arg1: memref<2xi32, #tpu.memory_space<smem>>) -> (i32, i32, i32) {
    %0 = arith.index_cast %arg0 : i32 to index
    %1 = memref.load %arg1[%0] : memref<2xi32, #tpu.memory_space<smem>>
    %c0_i32 = arith.constant 0 : i32
    %c0_i32_0 = arith.constant 0 : i32
    %c0_i32_1 = arith.constant 0 : i32
    return %1, %c0_i32, %c0_i32_0 : i32, i32, i32
  }
  func.func @transform_8(%arg0: i32, %arg1: memref<2xi32, #tpu.memory_space<smem>>) -> (i32, i32, i32) {
    %0 = arith.index_cast %arg0 : i32 to index
    %1 = memref.load %arg1[%0] : memref<2xi32, #tpu.memory_space<smem>>
    %c0_i32 = arith.constant 0 : i32
    %c0_i32_0 = arith.constant 0 : i32
    %c0_i32_1 = arith.constant 0 : i32
    return %1, %c0_i32, %c0_i32_0 : i32, i32, i32
  }
  func.func @transform_9(%arg0: i32, %arg1: memref<2xi32, #tpu.memory_space<smem>>) -> (i32, i32) {
    %c0_i32 = arith.constant 0 : i32
    %c0_i32_0 = arith.constant 0 : i32
    %c0_i32_1 = arith.constant 0 : i32
    return %c0_i32, %c0_i32_0 : i32, i32
  }
  func.func @transform_10(%arg0: i32, %arg1: memref<2xi32, #tpu.memory_space<smem>>) -> (i32, i32) {
    %c0_i32 = arith.constant 0 : i32
    %c0_i32_0 = arith.constant 0 : i32
    return %arg0, %c0_i32 : i32, i32
  }
}

</mosaic_0001>

<bundles_post_ra>
// kernel: tpu_custom_call.1
= control target key start
LH: loop header
LB: loop body
LE: loop exit
PB: predicated region body
PF: predicated region fallthrough
CT: control target
= control target key end

     0   :  { %s2936_s0 = inlined_call_operand.hbm [shape: s32[2], index: 0, kind: input, shape index: {}]   ;;  %s2937_s1 = inlined_call_operand.hbm [shape: bf16[32,128], index: 1, kind: input, shape index: {}]   ;;  %s2938_s2 = inlined_call_operand.hbm [shape: bf16[32,128], index: 2, kind: input, shape index: {}]   ;;  %s2939_s3 = inlined_call_operand.hbm [shape: bf16[2,128,128], index: 3, kind: input, shape index: {}]   ;;  %s2940_s4 = inlined_call_operand.vmem [shape: f32[2,1,128], index: 4, kind: input, shape index: {}]   ;;  %s2941_s5 = inlined_call_operand.hbm [shape: bf16[2,128,128], index: 5, kind: input, shape index: {}]   ;;  %s2942_s6 = inlined_call_operand.hbm [shape: bf16[2,128,128], index: 6, kind: input, shape index: {}]   ;;  %s2943_s7 = inlined_call_operand.vmem [shape: f32[2,1,128], index: 7, kind: input, shape index: {}]   ;;  %s2944_s8 = inlined_call_operand.vmem [shape: f32[2,1,128], index: 8, kind: input, shape index: {}]   ;;  %s2945_s9 = inlined_call_operand.vmem [shape: f32[2,1,128], index: 9, kind: input, shape index: {}]   ;;  %s2946_s10 = inlined_call_operand.hbm [shape: bf16[128,128], index: 10, kind: input, shape index: {}]   ;;  %s2947_s11 = inlined_call_operand.hbm [shape: bf16[32,128], index: 11, kind: output, shape index: {}]  }
   0x1   :  { %2983 = sst [smem:[#allocation41_spill]] %s2937_s1  ;;  %s1790_s19 = scalar_lea.hbm %s2936_s0, 16 }
   0x2   :  { %2984 = sst [smem:[#allocation42_spill]] %s2938_s2  ;;  %p1791_p0 = scmp.ne.s32.totalorder %s2936_s0, %s1790_s19 }
   0x3   :  { %2985 = sst [smem:[#allocation43_spill]] %s2939_s3  ;;  %p1794_p1 = scmp.lt.u32.totalorder %s1790_s19, %s2936_s0 }
   0x4   :  { %2986 = sst [smem:[#allocation44_spill]] %s2940_s4 }
   0x5   :  { %2987 = sst [smem:[#allocation45_spill]] %s2941_s5  ;;  %p1796_p2 = pnand %p1794_p1, %p1791_p0 }
   0x6   :  { %2988 = sst [smem:[#allocation46_spill]] %s2942_s6 }
   0x7   :  { %2989 = sst [smem:[#allocation47_spill]] %s2943_s7 }
   0x8   :  { %2990 = sst [smem:[#allocation48_spill]] %s2944_s8 }
   0x9   :  { %2991 = sst [smem:[#allocation49_spill]] %s2945_s9 }
   0xa   :  { %2992 = sst [smem:[#allocation50_spill]] %s2946_s10 }
   0xb   :  { %2993 = sst [smem:[#allocation51_spill]] %s2947_s11 }
   0xc   :  { %1799 = shalt.err (!%p1796_p2)  }
   0xd   :  { %s2140_s24 = smov [#allocation3]  }
   0xe   :  { %17 = dma.hbm_to_smem %s2936_s0, 16, %s2140_s24, [#allocation2] }
   0xf   :  { %2058 = dma.done.wait [#allocation2], 16 }
  0x10   :  { %2059 = vsyncadd [#allocation2], 4294967280 }
  0x11   :  { %19 = sfence }
  0x12   :  { %20 = vsyncpa [#allocation5], 0 }
  0x13   :  { %22 = vsyncpa [#allocation5 + $0x1], 0 }
  0x14   :  { %23 = vsyncpa [#allocation8], 0 }
  0x15   :  { %25 = vsyncpa [#allocation8 + $0x1], 0 }
  0x16   :  { %26 = vsyncpa [#allocation11], 0 }
  0x17   :  { %28 = vsyncpa [#allocation11 + $0x1], 0 }
  0x18   :  { %29 = vsyncpa [#allocation14], 0 }
  0x19   :  { %30 = vsyncpa [#allocation6], 0 }
  0x1a   :  { %32 = vsyncpa [#allocation6 + $0x1], 0  ;;  %s2226_s27 = smov 0   ;;  %s2228_s28 = smov 0  }
  0x1b   :  { %s2230_s29 = smov 0   ;;  %s2232_s30 = smov 0  }
  0x1c   :  { %s2234_s0 = smov 0   ;;  %s2236_s12 = smov 0  }
  0x1d   :  { %s2238_s13 = smov 0   ;;  %s2240_s14 = smov 0  }
  0x1e   :  { %s2242_s15 = smov 0   ;;  %s2244_s16 = smov 0  }
  0x1f   :  { %s2246_s17 = smov 0   ;;  %s2248_s18 = smov 0  }
  0x20   :  { %s2250_s19 = smov 0  }
  0x21 LB: > { %2994 = sst [smem:[#allocation30_spill]] %s2090_s27  ;;  %s2292_s20 = sadd.s32 4294967295, %s2138_s19   ;;  %s2138_s19 = sphi %s2250_s19, %s3087_s19   ;;  %s2134_s18 = sphi %s2248_s18, %s3086_s18   ;;  %s2130_s17 = sphi %s2246_s17, %s3085_s17   ;;  %s2126_s16 = sphi %s2244_s16, %s3084_s16   ;;  %s2122_s15 = sphi %s2242_s15, %s3083_s15   ;;  %s2118_s14 = sphi %s2240_s14, %s3082_s14   ;;  %s2114_s13 = sphi %s2238_s13, %s3081_s13   ;;  %s2110_s12 = sphi %s2236_s12, %s3076_s12   ;;  %s2106_s0 = sphi %s2234_s0, %s3075_s0   ;;  %s2102_s30 = sphi %s2232_s30, %s3074_s30   ;;  %s2098_s29 = sphi %s2230_s29, %s3080_s29   ;;  %s2094_s28 = sphi %s2228_s28, %s3079_s28   ;;  %s2090_s27 = sphi %s2226_s27, %s3078_s27  }
  0x22   : > { %2995 = sst [smem:[#allocation31_spill]] %s2106_s0  ;;  %s1383_s21 = sadd.s32 4294967294, %s2138_s19  }
  0x23   : > { %2996 = sst [smem:[#allocation32_spill]] %s2110_s12  ;;  %s2296_s22 = sadd.s32 1, %s2138_s19  }
  0x24   : > { %2997 = sst [smem:[#allocation33_spill]] %s2126_s16  ;;  %s45_s23 = sadd.s32 1, %s2134_s18 }
  0x25   : > { %s42_s24 = ssub.s32 %s2138_s19, %s2296_s22  ;;  %p52_p3 = scmp.ne.s32.totalorder %s2134_s18, %s2130_s17 }
  0x26   : > { %p43_p4 = scmp.eq.s32.totalorder %s42_s24, 0  ;;  %p2959_p5 = scmp.eq.s32.totalorder %s2138_s19, 0 }
  0x27   : > { %p2957_p6 = scmp.ne.s32.totalorder %s2130_s17, %s2126_s16  ;;  %p325_p7 = scmp.eq.s32.totalorder %s2292_s20, 1 }
  0x28   : > { %s2308_s25 = scalar_select %p43_p4, %s2134_s18, %s45_s23  }
  0x29   : > { %p54_p8 = por %p2959_p5, %p52_p3  ;;  %p2312_p9 = por %p325_p7, %p52_p3 }
  0x2a   : > { %2998 = sst [smem:[#allocation34_spill]] %s2308_s25  ;;  %p331_p10 = scmp.eq.s32.totalorder %s1383_s21, 1 }
  0x2b   : > { %s2999_s26 = scalar_select %p2312_p9, 1, 0 }
  0x2c   : > { %p2319_p11 = por %p331_p10, %p2957_p6  ;;  %p2958_p13 = scmp.lt.s32.totalorder %s2138_s19, 2 }
  0x2d   : > { %3000 = sst [smem:[#allocation35_spill]] %s2999_s26  ;;  %s2952_s24 = sand.u32 1, %s2134_s18  }
  0x2e   : > { %s3001_s11 = scalar_select %p2319_p11, 1, 0 }
  0x2f   : > { %s2328_s9 = sshll.u32 %s2952_s24, 3  ;;  %s2954_s23 = sshll.u32 %s2138_s19, 7 }
  0x30   : > { %3002 = sst [smem:[#allocation36_spill]] %s3001_s11  ;;  %p2333_p0 = pnand %p2958_p13, %p54_p8 }
  0x31   : > { %s2964_s21 = sand.u32 1, %s2138_s19   ;;  %s3004_s2 = sld [smem:[#allocation42_spill]] }
  0x32   : > { %s3003_s25 = scalar_select %p2333_p0, 1, 0 }
  0x33   : > { %s389_s24 = scalar_lea.vmem [#allocation7], %s2328_s9  ;;  %s2350_s4 = scalar_lea.sflag [#allocation8], %s2964_s21 }
  0x34   : > { %s396_s7 = sshll.u32 %s389_s24, 4  ;;  %3005 = sst [smem:[#allocation37_spill]] %s2350_s4  ;;  %s2346_s7 = int_to_ptr.vmem [resolvable:$true] %s396_s7 }
  0x35   : > { %p2974_p2 = pneg %p2333_p0 }
  0x37   : > { %s2343_s11 = scalar_lea.hbm %s3004_s2, %s2954_s23  ;;  %s1805_s23 = scalar_lea.hbm %s3004_s2, 256 }
  0x38   : > { %s1800_s6 = scalar_lea.hbm %s2343_s11, 128  ;;  %p1806_p7 = scmp.lt.u32.totalorder %s2343_s11, %s3004_s2 }
  0x39   : > { %p1801_p1 = scmp.ne.s32.totalorder %s2343_s11, %s1800_s6  ;;  %p1807_p8 = scmp.lt.u32.totalorder %s1805_s23, %s1800_s6 }
  0x3a   : > { %p1809_p12 = scmp.lt.u32.totalorder %s1800_s6, %s2343_s11 }
  0x3b   : > { %p1803_p3 = pnand %p2974_p2, %p1801_p1  ;;  %p1808_p10 = por %p1807_p8, %p1806_p7 }
  0x3d   : > { %p1804_p4 = pneg %p1803_p3  ;;  %p1810_p6 = por %p1809_p12, %p1808_p10 }
  0x3f   : > { %p1811_p13 = pnand %p1810_p6, %p1804_p4 }
  0x41   : > { %1814 = shalt.err (!%p1811_p13)
}
  0x42   : > { %s1815_s24 = scalar_lea.vmem %s2346_s7, 128  ;;  %s2141_s8 = smov [#allocation7]  }
  0x43   : > { %p1816_p1 = scmp.ne.s32.totalorder %s2346_s7, %s1815_s24  ;;  %s1820_s26 = sshll.u32 %s2141_s8, 4  ;;  %s1821_s26 = int_to_ptr.vmem [resolvable:$false] %s1820_s26 }
  0x44   : > { %s1822_s3 = scalar_lea.vmem %s1821_s26, 256  ;;  %p1823_p11 = scmp.lt.s32.totalorder %s2346_s7, %s1821_s26 }
  0x45   : > { %p1818_p3 = pnand %p1816_p1, %p2974_p2  ;;  %p1824_p7 = scmp.lt.s32.totalorder %s1822_s3, %s1815_s24 }
  0x47   : > { %p1819_p5 = pneg %p1818_p3  ;;  %p1825_p8 = por %p1824_p7, %p1823_p11 }
  0x49   : > { %p1826_p12 = pnand %p1825_p8, %p1819_p5 }
  0x4b   : > { %1829 = shalt.err (!%p1826_p12)
}
  0x4c   : > { %s2960_s6 = smov 64   ;;  %s2962_s27 = smov 4  }
  0x4d   : > { %1616 = dma.hbm_to_vmem [thread:$0]  (!%p2333_p0), %s2343_s11, 128, %s2346_s7, %s2350_s4, %s2960_s6, %s2960_s6, %s2962_s27  }
  0x4e   : > { %s150_s23 = sld [smem:[#allocation3 + %s2138_s19]]  ;;  %s155_s8 = sadd.s32 1, %s2110_s12 }
  0x4f   : > { %s151_s24 = sld [smem:[#allocation3 + %s2296_s22]]  ;;  %p162_p5 = scmp.ne.s32.totalorder %s2110_s12, %s2106_s0 }
  0x50   : > { %p168_p6 = scmp.ne.s32.totalorder %s2106_s0, %s2102_s30  ;;  %p3006_p11 = scmp.eq.s32.totalorder %s2138_s19, 0 }
  0x51   : > { %s438_s7 = sand.u32 1, %s2110_s12   ;;  %p2973_p4 = scmp.eq.s32.totalorder %s2292_s20, 0 }
  0x52   : > { %p2390_p13 = por %p162_p5, %p3006_p11  ;;  %s1396_s11 = sshll.u32 %s438_s7, 6 }
  0x53   : > { %p3008_p10 = scmp.lt.s32.totalorder %s2138_s19, 2  ;;  %s440_s27 = scalar_lea.vmem [#allocation10], %s1396_s11 }
  0x54   : > { %s448_s21 = sshll.u32 %s440_s27, 4  ;;  %p3013_p12 = scmp.ne.s32.totalorder %s2130_s17, %s2126_s16  ;;  %s2404_s21 = int_to_ptr.vmem [resolvable:$true] %s448_s21 }
  0x55   : > { %p2400_p1 = pnand %p3008_p10, %p2390_p13  ;;  %s152_s6 = ssub.s32 %s150_s23, %s151_s24 }
  0x56   : > { %p153_p3 = scmp.eq.s32.totalorder %s152_s6, 0  ;;  %p3011_p7 = pmov %p3008_p10 }
  0x57   : > { %s1591_s2 = scalar_select %p2390_p13, [#allocation3], [#allocation17] }
  0x58   : > { %s2409_s4 = scalar_select %p153_p3, %s2110_s12, %s155_s8  }
  0x59   : > { %s1592_s7 = scalar_select %p2390_p13, %s2138_s19, 0 }
  0x5a   : > { %3010 = sst [smem:[#allocation38_spill]] %s2409_s4  ;;  %s3089_s2 = smov (!%p3011_p7, %s1591_s2), [#allocation20] }
  0x5b   : > { %p3012_p8 = pmov %p3011_p7  ;;  %p2423_p5 = por %p2973_p4, %p3013_p12 }
  0x5c   : > { %p2432_p11 = por %p168_p6, %p2973_p4  ;;  %p1384_p13 = scmp.ge.s32.totalorder %s2138_s19, 1 }
  0x5d   : > { %s3091_s7 = smov (!%p3012_p8, %s1592_s7), 0  ;;  %p338_p10 = scmp.lt.s32.totalorder %s2138_s19, 3 }
  0x5e   : > { %s3014_s27 = scalar_select %p2423_p5, 1, 0 }
  0x5f   : > { %s441_s6 = sld [smem:[%s3089_s2 + %s3091_s7]]  ;;  %p2438_p3 = pnand %p1384_p13, %p338_p10 }
  0x60   : > { %3015 = sst [smem:[#allocation39_spill]] %s3014_s27  ;;  %s2144_s8 = smov [#allocation13]  }
  0x61   : > { %s3016_s23 = scalar_select %p2432_p11, 1, 0 }
  0x62   : > { %s3018_s24 = scalar_select %p2438_p3, 1, 0 }
  0x63   : > { %3017 = sst [smem:[#allocation40_spill]] %s3016_s23  ;;  %s350_s26 = sshll.u32 %s2144_s8, 4  ;;  %s2442_s26 = int_to_ptr.vmem [resolvable:$true] %s350_s26 }
  0x64   : > { %p1606_p7 = pneg %p2438_p3  ;;  %s3019_s2 = sshll.u32 %s2138_s19, 7 }
  0x65   : > { %s3020_s1 = sld [smem:[#allocation41_spill]]  ;;  %s1458_s4 = sshll.u32 %s441_s6, 10 }
  0x66   : > { %s368_s12 = scalar_lea.vmem [#allocation4], %s2328_s9  ;;  %s3021_s5 = sld [smem:[#allocation45_spill]] }
  0x67   : > { %s2454_s16 = sshll.u32 %s368_s12, 4  ;;  %p2463_p6 = pnand %p1606_p7, %p2973_p4  ;;  %s2501_s16 = int_to_ptr.vmem [resolvable:$true] %s2454_s16 }
  0x68   : > { %p1832_p12 = pneg %p2400_p1 }
  0x6b   : > { %s2451_s7 = scalar_lea.hbm %s3020_s1, %s3019_s2  ;;  %s3023_s2 = sand.u32 1, %s2138_s19  }
  0x6c   : > { %s2459_s27 = scalar_lea.hbm %s3021_s5, %s1458_s4  ;;  %s2469_s30 = scalar_lea.sflag [#allocation11], %s3023_s2 }
  0x6d   : > { %s1830_s9 = scalar_lea.hbm %s2459_s27, 1024  ;;  %s1835_s12 = scalar_lea.hbm %s3021_s5, 2048 }
  0x6e   : > { %p1831_p8 = scmp.ne.s32.totalorder %s2459_s27, %s1830_s9  ;;  %p1836_p7 = scmp.lt.u32.totalorder %s2459_s27, %s3021_s5 }
  0x6f   : > { %p1837_p4 = scmp.lt.u32.totalorder %s1835_s12, %s1830_s9  ;;  %p1839_p9 = scmp.lt.u32.totalorder %s1830_s9, %s2459_s27 }
  0x70   : > { %p1833_p13 = pnand %p1832_p12, %p1831_p8 }
  0x71   : > { %p1838_p2 = por %p1837_p4, %p1836_p7 }
  0x72   : > { %p1834_p10 = pneg %p1833_p13 }
  0x73   : > { %p1840_p11 = por %p1839_p9, %p1838_p2 }
  0x75   : > { %p1841_p5 = pnand %p1840_p11, %p1834_p10 }
  0x77   : > { %1844 = shalt.err (!%p1841_p5)
}
  0x78   : > { %s1845_s11 = scalar_lea.vmem %s2404_s21, 1024  ;;  %s2145_s2 = smov [#allocation10]  }
  0x79   : > { %p1846_p8 = scmp.ne.s32.totalorder %s2404_s21, %s1845_s11  ;;  %s1850_s4 = sshll.u32 %s2145_s2, 4  ;;  %s1851_s4 = int_to_ptr.vmem [resolvable:$false] %s1850_s4 }
  0x7a   : > { %s1852_s0 = scalar_lea.vmem %s1851_s4, 2048  ;;  %p1853_p0 = scmp.lt.s32.totalorder %s2404_s21, %s1851_s4 }
  0x7b   : > { %p1848_p13 = pnand %p1846_p8, %p1832_p12  ;;  %p1854_p4 = scmp.lt.s32.totalorder %s1852_s0, %s1845_s11 }
  0x7d   : > { %p1849_p3 = pneg %p1848_p13  ;;  %p1855_p7 = por %p1854_p4, %p1853_p0 }
  0x7f   : > { %p1856_p9 = pnand %p1855_p7, %p1849_p3 }
  0x81   : > { %1859 = shalt.err (!%p1856_p9)
}
  0x82   : > { %s3024_s9 = smov 4   ;;  %s3025_s12 = smov 64  }
  0x83   : > { %1626 = dma.hbm_to_vmem [thread:$0]  (!%p2400_p1), %s2459_s27, 1024, %s2404_s21, %s2469_s30, %s3025_s12, %s3025_s12, %s3024_s9  }
  0x84   : > { %s3026_s10 = sld [smem:[#allocation50_spill]]  ;;  %p1862_p2 = pneg %p2463_p6 }
  0x8a   : > { %s1860_s11 = scalar_lea.hbm %s3026_s10, 1024 }
  0x8b   : > { %p1861_p0 = scmp.ne.s32.totalorder %s3026_s10, %s1860_s11  ;;  %p1867_p3 = scmp.lt.u32.totalorder %s1860_s11, %s3026_s10 }
  0x8d   : > { %p1863_p5 = pnand %p1862_p2, %p1861_p0 }
  0x8f   : > { %p1864_p11 = pneg %p1863_p5 }
  0x91   : > { %p1869_p12 = pnand %p1867_p3, %p1864_p11 }
  0x93   : > { %1872 = shalt.err (!%p1869_p12)
}
  0x94   : > { %s1873_s21 = scalar_lea.vmem %s2442_s26, 1024  ;;  %p1881_p13 = scmp.lt.s32.totalorder %s2442_s26, %s2442_s26 }
  0x95   : > { %p1874_p1 = scmp.ne.s32.totalorder %s2442_s26, %s1873_s21  ;;  %p1882_p4 = scmp.lt.s32.totalorder %s1873_s21, %s1873_s21 }
  0x97   : > { %p1876_p10 = pnand %p1874_p1, %p1862_p2  ;;  %p1883_p7 = por %p1882_p4, %p1881_p13 }
  0x99   : > { %p1877_p8 = pneg %p1876_p10 }
  0x9b   : > { %p1884_p9 = pnand %p1883_p7, %p1877_p8 }
  0x9d   : > { %1887 = shalt.err (!%p1884_p9)
}
  0x9e   : > { %1609 = dma.hbm_to_vmem [thread:$0]  (!%p2463_p6), %s3026_s10, 1024, %s2442_s26, [#allocation14], %s3025_s12, %s3025_s12, %s3024_s9  }
  0x9f   : > { %s3027_s23 = sand.u32 1, %s2134_s18   ;;  %s1888_s2 = scalar_lea.hbm %s2451_s7, 128 }
  0xa0   : > { %s2529_s11 = scalar_lea.sflag [#allocation5], %s3027_s23  ;;  %p1889_p0 = scmp.ne.s32.totalorder %s2451_s7, %s1888_s2 }
  0xa1   : > { %p3028_p2 = scmp.ne.s32.totalorder %s3003_s25, 0  ;;  %s1893_s3 = scalar_lea.hbm %s3020_s1, 256 }
  0xa2   : > { %p1894_p12 = scmp.lt.u32.totalorder %s2451_s7, %s3020_s1  ;;  %p1895_p1 = scmp.lt.u32.totalorder %s1893_s3, %s1888_s2 }
  0xa3   : > { %p3029_p5 = pneg %p3028_p2  ;;  %p1897_p6 = scmp.lt.u32.totalorder %s1888_s2, %s2451_s7 }
  0xa4   : > { %p1896_p10 = por %p1895_p1, %p1894_p12 }
  0xa5   : > { %p1891_p11 = pnand %p1889_p0, %p3029_p5 }
  0xa6   : > { %p1898_p8 = por %p1897_p6, %p1896_p10 }
  0xa7   : > { %p1892_p3 = pneg %p1891_p11 }
  0xa9   : > { %p1899_p13 = pnand %p1898_p8, %p1892_p3 }
  0xab   : > { %1902 = shalt.err (!%p1899_p13)
}
  0xac   : > { %s1903_s26 = scalar_lea.vmem %s2501_s16, 128  ;;  %p3030_p7 = pmov %p3029_p5 }
  0xad   : > { %p1904_p4 = scmp.ne.s32.totalorder %s2501_s16, %s1903_s26  ;;  %s2146_s27 = smov [#allocation4]  }
  0xae   : > { %s1908_s6 = sshll.u32 %s2146_s27, 4  ;;  %s1909_s6 = int_to_ptr.vmem [resolvable:$false] %s1908_s6 }
  0xaf   : > { %p1906_p9 = pnand %p1904_p4, %p3030_p7  ;;  %s1910_s23 = scalar_lea.vmem %s1909_s6, 256 }
  0xb0   : > { %p1911_p5 = scmp.lt.s32.totalorder %s2501_s16, %s1909_s6  ;;  %p1912_p11 = scmp.lt.s32.totalorder %s1910_s23, %s1903_s26 }
  0xb1   : > { %p1907_p0 = pneg %p1906_p9 }
  0xb2   : > { %p1913_p12 = por %p1912_p11, %p1911_p5 }
  0xb4   : > { %p1914_p1 = pnand %p1913_p12, %p1907_p0 }
  0xb6   : > { %1917 = shalt.err (!%p1914_p1)
}
  0xb7   : > { %1613 = dma.hbm_to_vmem [thread:$0]  (!%p3028_p2), %s2451_s7, 128, %s2501_s16, %s2529_s11, %s3025_s12, %s3025_s12, %s3024_s9  }
  0xb8   : > { %s94_s25 = sld [smem:[#allocation3 + %s2138_s19]]  ;;  %p106_p3 = scmp.ne.s32.totalorder %s2122_s15, %s2118_s14 }
  0xb9   : > { %s95_s2 = sld [smem:[#allocation3 + %s2296_s22]]  ;;  %p112_p10 = scmp.ne.s32.totalorder %s2118_s14, %s2114_s13 }
  0xba   : > { %s408_s8 = sand.u32 1, %s2122_s15   ;;  %p3031_p6 = scmp.eq.s32.totalorder %s2138_s19, 0 }
  0xbb   : > { %s1393_s3 = sshll.u32 %s408_s8, 6  ;;  %p3033_p2 = scmp.eq.s32.totalorder %s2292_s20, 0 }
  0xbc   : > { %p2567_p8 = por %p106_p3, %p3031_p6  ;;  %s3035_s7 = sld [smem:[#allocation30_spill]] }
  0xbd   : > { %p2573_p13 = por %p112_p10, %p3033_p2  ;;  %s99_s0 = sadd.s32 1, %s2122_s15 }
  0xbe   : > { %s1588_s13 = scalar_select %p2567_p8, [#allocation3], [#allocation16] }
  0xbf   : > { %s3034_s16 = scalar_select %p2573_p13, 1, 0 }
  0xc0   : > { %s96_s11 = ssub.s32 %s94_s25, %s95_s2  ;;  %s410_s21 = scalar_lea.vmem [#allocation9], %s1393_s3 }
  0xc1   : > { %p97_p4 = scmp.eq.s32.totalorder %s96_s11, 0  ;;  %s418_s26 = sshll.u32 %s410_s21, 4  ;;  %s2601_s26 = int_to_ptr.vmem [resolvable:$true] %s418_s26 }
  0xc2   : > { %s1589_s27 = scalar_select %p2567_p8, %s2138_s19, 0 }
  0xc3   : > { %s2584_s6 = scalar_select %p97_p4, %s2122_s15, %s99_s0  }
  0xc4   : > { %p3036_p7 = scmp.lt.s32.totalorder %s2138_s19, 2  ;;  %s2599_s2 = sld [smem:[#allocation3 + %s2138_s19]] }
  0xc5   : > { %s2604_s8 = sld [smem:[#allocation3 + %s2296_s22]]  ;;  %p190_p11 = scmp.ne.s32.totalorder %s2098_s29, %s2094_s28 }
  0xc6   : > { %s3093_s13 = smov (!%p3036_p7, %s1588_s13), [#allocation19]  ;;  %p3037_p9 = pmov %p3036_p7 }
  0xc7   : > { %p3038_p0 = pmov %p3036_p7  ;;  %s3040_s21 = sld [smem:[#allocation43_spill]] }
  0xc8   : > { %s3095_s27 = smov (!%p3037_p9, %s1589_s27), 0  ;;  %p3041_p1 = pmov %p3031_p6 }
  0xc9   : > { %p2594_p5 = pnand %p3038_p0, %p2567_p8  ;;  %s411_s25 = sld [smem:[%s3093_s13 + %s3095_s27]] }
  0xca   : > { %p2618_p3 = por %p190_p11, %p3041_p1 }
  0xcb   : > { %p1920_p6 = pneg %p2594_p5 }
  0xcd   : > { %s1923_s0 = scalar_lea.hbm %s3040_s21, 2048 }
  0xcf   : > { %s1457_s3 = sshll.u32 %s411_s25, 10 }
  0xd0   : > { %s2614_s1 = scalar_lea.hbm %s3040_s21, %s1457_s3 }
  0xd1   : > { %s1918_s27 = scalar_lea.hbm %s2614_s1, 1024  ;;  %p1924_p4 = scmp.lt.u32.totalorder %s2614_s1, %s3040_s21 }
  0xd2   : > { %p1919_p10 = scmp.ne.s32.totalorder %s2614_s1, %s1918_s27  ;;  %p1925_p7 = scmp.lt.u32.totalorder %s1923_s0, %s1918_s27 }
  0xd3   : > { %p1927_p0 = scmp.lt.u32.totalorder %s1918_s27, %s2614_s1 }
  0xd4   : > { %p1921_p8 = pnand %p1920_p6, %p1919_p10  ;;  %p1926_p9 = por %p1925_p7, %p1924_p4 }
  0xd6   : > { %p1922_p2 = pneg %p1921_p8  ;;  %p1928_p11 = por %p1927_p0, %p1926_p9 }
  0xd8   : > { %p1929_p1 = pnand %p1928_p11, %p1922_p2 }
  0xda   : > { %1932 = shalt.err (!%p1929_p1)
}
  0xdb   : > { %s1933_s5 = scalar_lea.vmem %s2601_s26, 1024  ;;  %s2147_s25 = smov [#allocation9]  }
  0xdc   : > { %p1934_p10 = scmp.ne.s32.totalorder %s2601_s26, %s1933_s5  ;;  %s1938_s3 = sshll.u32 %s2147_s25, 4  ;;  %s1939_s3 = int_to_ptr.vmem [resolvable:$false] %s1938_s3 }
  0xdd   : > { %s1940_s11 = scalar_lea.vmem %s1939_s3, 2048  ;;  %p1941_p13 = scmp.lt.s32.totalorder %s2601_s26, %s1939_s3 }
  0xde   : > { %p1936_p8 = pnand %p1934_p10, %p1920_p6  ;;  %p1942_p4 = scmp.lt.s32.totalorder %s1940_s11, %s1933_s5 }
  0xe0   : > { %p1937_p12 = pneg %p1936_p8  ;;  %p1943_p7 = por %p1942_p4, %p1941_p13 }
  0xe2   : > { %p1944_p9 = pnand %p1943_p7, %p1937_p12 }
  0xe4   : > { %1947 = shalt.err (!%p1944_p9)
}
  0xe5   : > { %s3043_s27 = sld [smem:[#allocation37_spill]]  ;;  %p3044_p13 = scmp.eq.s32.totalorder %s2292_s20, 0 }
  0xe6   : > { %p3045_p12 = scmp.ne.s32.totalorder %s2094_s28, %s3035_s7  ;;  %s180_s23 = ssub.s32 %s2599_s2, %s2604_s8 }
  0xe7   : > { %s183_s0 = sadd.s32 1, %s2098_s29  ;;  %p181_p2 = scmp.eq.s32.totalorder %s180_s23, 0 }
  0xe8   : > { %p2656_p6 = por %p3045_p12, %p3044_p13  ;;  %s3047_s4 = sand.u32 1, %s2098_s29  }
  0xe9   : > { %s1399_s25 = sshll.u32 %s3047_s4, 6  ;;  %p3048_p0 = scmp.lt.s32.totalorder %s2138_s19, 2 }
  0xea   : > { %s1594_s3 = scalar_select %p2618_p3, [#allocation3], [#allocation18] }
  0xeb   : > { %1621 = dma.hbm_to_vmem [thread:$0]  (!%p2594_p5), %s2614_s1, 1024, %s2601_s26, %s3043_s27, %s3025_s12, %s3025_s12, %s3024_s9  }
  0xec   : > { %s2668_s11 = scalar_select %p181_p2, %s2098_s29, %s183_s0  }
  0xed   : > { %s1595_s10 = scalar_select %p2618_p3, %s2138_s19, 0 }
  0xee   : > { %s3097_s3 = smov (!%p3048_p0, %s1594_s3), [#allocation21]  ;;  %p3049_p5 = pmov %p3048_p0 }
  0xef   : > { %p3050_p11 = pmov %p3048_p0  ;;  %s462_s26 = scalar_lea.vmem [#allocation12], %s1399_s25 }
  0xf0   : > { %s3099_s10 = smov (!%p3049_p5, %s1595_s10), 0  ;;  %s470_s2 = sshll.u32 %s462_s26, 4  ;;  %s2685_s2 = int_to_ptr.vmem [resolvable:$true] %s470_s2 }
  0xf1   : > { %p2681_p1 = pnand %p3050_p11, %p2618_p3  ;;  %s463_s7 = sld [smem:[%s3097_s3 + %s3099_s10]] }
  0xf2   : > { %s3052_s0 = sld [smem:[#allocation46_spill]] }
  0xf3   : > { %p1950_p10 = pneg %p2681_p1 }
  0xf7   : > { %s1459_s8 = sshll.u32 %s463_s7, 10 }
  0xf8   : > { %s3053_s4 = smov %s3052_s0  ;;  %s2690_s21 = scalar_lea.hbm %s3052_s0, %s1459_s8 }
  0xf9   : > { %s1948_s13 = scalar_lea.hbm %s2690_s21, 1024  ;;  %s1953_s3 = scalar_lea.hbm %s3053_s4, 2048 }
  0xfa   : > { %p1949_p3 = scmp.ne.s32.totalorder %s2690_s21, %s1948_s13  ;;  %p1954_p7 = scmp.lt.u32.totalorder %s2690_s21, %s3053_s4 }
  0xfb   : > { %p1955_p9 = scmp.lt.u32.totalorder %s1953_s3, %s1948_s13  ;;  %p1957_p12 = scmp.lt.u32.totalorder %s1948_s13, %s2690_s21 }
  0xfc   : > { %p1951_p8 = pnand %p1950_p10, %p1949_p3 }
  0xfd   : > { %p1956_p13 = por %p1955_p9, %p1954_p7 }
  0xfe   : > { %p1952_p4 = pneg %p1951_p8 }
  0xff   : > { %p1958_p2 = por %p1957_p12, %p1956_p13 }
 0x101   : > { %p1959_p0 = pnand %p1958_p2, %p1952_p4 }
 0x103   : > { %1962 = shalt.err (!%p1959_p0)
}
 0x104   : > { %s1963_s8 = scalar_lea.vmem %s2685_s2, 1024  ;;  %s2148_s27 = smov [#allocation12]  }
 0x105   : > { %p1964_p5 = scmp.ne.s32.totalorder %s2685_s2, %s1963_s8  ;;  %s1968_s23 = sshll.u32 %s2148_s27, 4  ;;  %s1969_s23 = int_to_ptr.vmem [resolvable:$false] %s1968_s23 }
 0x106   : > { %s1970_s0 = scalar_lea.vmem %s1969_s23, 2048  ;;  %p1971_p8 = scmp.lt.s32.totalorder %s2685_s2, %s1969_s23 }
 0x107   : > { %p1966_p11 = pnand %p1964_p5, %p1950_p10  ;;  %p1972_p7 = scmp.lt.s32.totalorder %s1970_s0, %s1963_s8 }
 0x109   : > { %p1967_p3 = pneg %p1966_p11  ;;  %p1973_p9 = por %p1972_p7, %p1971_p8 }
 0x10b   : > { %p1974_p13 = pnand %p1973_p9, %p1967_p3 }
 0x10d   : > { %1977 = shalt.err (!%p1974_p13)
}
 0x10e   : > { %1631 = dma.hbm_to_vmem [thread:$0]  (!%p2681_p1), %s2690_s21, 1024, %s2685_s2, %s2469_s30, %s3025_s12, %s3025_s12, %s3024_s9  }
 0x10f   : > { %p3054_p10 = scmp.ne.s32.totalorder %s3018_s24, 0 }
 0x110   : > { %s3055_s13 = sld [smem:[#allocation39_spill]] (!%p3054_p10)  ;;  %s2724_s10 = sand.u32 (!%p3054_p10), 1, %s2130_s17  }
 0x111   : > { %506 = sbr.rel (%p3054_p10) target bundleno = 1181 (0x49d), region = 60  ;;  %s2727_s25 = sshll.u32 (!%p3054_p10), %s2724_s10, 3 }
 0x112   : > { %s509_s1 = scalar_lea.sflag (!%p3054_p10), [#allocation5], %s2724_s10  ;;  %s512_s3 = scalar_lea.vmem (!%p3054_p10), [#allocation4], %s2727_s25 }
 0x116   : > { %p3056_p4 = scmp.ne.s32.totalorder (!%p3054_p10), %s3055_s13, 0 }
 0x118   : > { %2061 = dma.done.wait (%p3056_p4), %s509_s1, 128  }
 0x119   : > { %2063 = vsyncadd (%p3056_p4), %s509_s1, 4294967168  ;;  %s517_s24 = sand.u32 1, %s2292_s20   ;;  %s521_s9 = scalar_lea.vmem [#allocation7], %s2727_s25 }
 0x11a   : > { %s518_s30 = scalar_lea.sflag [#allocation8], %s517_s24 }
 0x11b   : > { %2065 = dma.done.wait (%p3056_p4), %s518_s30, 128  }
 0x11c   : > { %2067 = vsyncadd (%p3056_p4), %s518_s30, 4294967168  ;;  %s528_s12 = sand.u32 1, %s2118_s14   ;;  %p3057_p1 = scmp.ne.s32.totalorder %s3034_s16, 0 }
 0x11d   : > { %s1405_s21 = sshll.u32 %s528_s12, 6 }
 0x11e   : > { %s2742_s2 = scalar_lea.vmem [#allocation9], %s1405_s21 }
 0x11f   : > { %2069 = dma.done.wait (%p3057_p1), %s518_s30, 1024  }
 0x120   : > { %2071 = vsyncadd (%p3057_p1), %s518_s30, 4294966272  ;;  %s3058_s7 = sld [smem:[#allocation31_spill]]  ;;  %s3059_s26 = sld [smem:[#allocation40_spill]] }
 0x121   : > { %s536_s23 = scalar_lea.sflag [#allocation11], %s517_s24 }
 0x126   : > { %s537_s8 = sand.u32 1, %s3058_s7   ;;  %p3060_p12 = scmp.ne.s32.totalorder %s3059_s26, 0 }
 0x127   : > { %s1406_s27 = sshll.u32 %s537_s8, 6 }
 0x128   : > { %s2749_s0 = scalar_lea.vmem [#allocation10], %s1406_s27 }
 0x129   : > { %2073 = dma.done.wait (%p3060_p12), %s536_s23, 1024  }
 0x12a   : > { %2075 = vsyncadd (%p3060_p12), %s536_s23, 4294966272  ;;  %s546_s13 = sand.u32 1, %s2094_s28  }
 0x12b   : > { %s1407_s1 = sshll.u32 %s546_s13, 6 }
 0x12c   : > { %s2756_s12 = scalar_lea.vmem [#allocation12], %s1407_s1 }
 0x12d   : > { %2077 = dma.done.wait (%p2656_p6), %s536_s23, 1024  }
 0x12e   : > { %2079 = vsyncadd (%p2656_p6), %s536_s23, 4294966272  ;;  %p3061_p2 = scmp.eq.s32.totalorder %s2292_s20, 0 }
 0x130   : > { %2081 = dma.done.wait (%p3061_p2), [#allocation14], 1024   ;;  %p3062_p0 = pmov %p3061_p2 }
 0x131   : > { %v2149_v0 = vmov 0.0   ;;  %vm2150_vm0 = vmmov 0   ;;  %v1752_v1 = vld [vmem:[%s2742_s2] sm:$0xff]   ;;  %v1753_v2 = vld [vmem:[%s2742_s2 + $0x8] sm:$0xff]   ;;  %v1754_v3 = vld [vmem:[%s2742_s2 + $0x10] sm:$0xff]   ;;  %s628_s16 = sld [smem:[#allocation3 + %s2292_s20]] }
 0x132   : > { %2083 = vsyncadd (%p3062_p0), [#allocation14], 4294966272  ;;  %1504 = vmatprep.subr.bf16.mxu0 %v2149_v0  ;;  %1520 = vmatprep.mubr.msk.bf16.mxu0 %vm2150_vm0, %v2149_v0  ;;  %v1761_v4 = vld [vmem:[%s2756_s12] sm:$0xff]   ;;  %v1755_v5 = vld [vmem:[%s2742_s2 + $0x18] sm:$0xff]   ;;  %s3063_s24 = sld [smem:[#allocation44_spill]]  ;;  %s3064_s7 = sld [smem:[#allocation47_spill]] }
 0x133   : > { %1524 = vmatprep.subr.bf16.mxu1 %v2149_v0  ;;  %1540 = vmatprep.mubr.msk.bf16.mxu1 %vm2150_vm0, %v2149_v0  ;;  %v1763_v6 = vld [vmem:[%s2756_s12 + $0x8] sm:$0xff]   ;;  %v1756_v7 = vld [vmem:[%s2742_s2 + $0x20] sm:$0xff]   ;;  %v1765_v8 = vld [vmem:[%s2756_s12 + $0x10] sm:$0xff]   ;;  %s640_s8 = sld [smem:[#allocation3 + %s2292_s20]]  ;;  %s1462_s21 = sshll.u32 %s2292_s20, 7 }
 0x134   : > { %1505 = vmatpush3.bf16.msra.mxu0 %v1752_v1  ;;  %1525 = vmatpush3.bf16.msra.mxu1 %v1761_v4  ;;  %v1757_v9 = vld [vmem:[%s2742_s2 + $0x28] sm:$0xff]   ;;  %v1767_v10 = vld [vmem:[%s2756_s12 + $0x18] sm:$0xff]   ;;  %v1758_v11 = vld [vmem:[%s2742_s2 + $0x30] sm:$0xff]   ;;  %s645_s27 = sld [smem:[#allocation3 + %s2292_s20]] }
 0x135   : > { %1506 = vmatprep.subr.bf16.mxu0 %v2149_v0  ;;  %1526 = vmatprep.subr.bf16.mxu1 %v2149_v0  ;;  %v1769_v12 = vld [vmem:[%s2756_s12 + $0x20] sm:$0xff]   ;;  %v1759_v13 = vld [vmem:[%s2742_s2 + $0x38] sm:$0xff]   ;;  %v1771_v14 = vld [vmem:[%s2756_s12 + $0x28] sm:$0xff]   ;;  %s3065_s13 = sld [smem:[#allocation48_spill]]  ;;  %s3066_s5 = sld [smem:[#allocation49_spill]] }
 0x136   : > { %v1760_v15 = vld [vmem:[%s512_s3] sm:$0xff]   ;;  %v1773_v17 = vld [vmem:[%s2756_s12 + $0x30] sm:$0xff]   ;;  %v1768_v20 = vld [vmem:[%s2749_s0 + $0x18] sm:$0xff]  }
 0x137   : > { %v1762_v16 = vld [vmem:[%s2749_s0] sm:$0xff]   ;;  %v1764_v18 = vld [vmem:[%s2749_s0 + $0x8] sm:$0xff]   ;;  %v1766_v19 = vld [vmem:[%s2749_s0 + $0x10] sm:$0xff]   ;;  %p629_p6 = scmp.lt.s32.totalorder %s628_s16, 1 }
 0x138   : > { %1507 = vmatpush3.bf16.msra.mxu0 %v1753_v2  ;;  %1527 = vmatpush3.bf16.msra.mxu1 %v1763_v6  ;;  %v1770_v21 = vld [vmem:[%s2749_s0 + $0x20] sm:$0xff]   ;;  %v1772_v22 = vld [vmem:[%s2749_s0 + $0x28] sm:$0xff]   ;;  %v1774_v23 = vld [vmem:[%s2749_s0 + $0x30] sm:$0xff]  }
 0x139   : > { %1508 = vmatprep.subr.bf16.mxu0 %v2149_v0  ;;  %1528 = vmatprep.subr.bf16.mxu1 %v2149_v0  ;;  %v1775_v24 = vld [vmem:[%s2756_s12 + $0x38] sm:$0xff]   ;;  %s3101_s16 = smov (!%p629_p6, %s628_s16), 1  ;;  %v1778_v52 = vld [vmem:[#allocation13] sm:$0xff]   ;;  %v1779_v53 = vld [vmem:[#allocation13 + $0x8] sm:$0xff]   ;;  %p641_p11 = scmp.lt.s32.totalorder %s640_s8, 1 }
 0x13a   : > { %v1776_v25 = vld [vmem:[%s521_s9] sm:$0xff]   ;;  %s631_s30 = scalar_lea.vmem %s3063_s24, %s3101_s16  ;;  %s635_s9 = sld [smem:[#allocation3 + %s2292_s20]]  ;;  %v1782_v56 = vld [vmem:[#allocation13 + $0x20] sm:$0xff]   ;;  %v1783_v57 = vld [vmem:[#allocation13 + $0x28] sm:$0xff]  }
 0x13b   : > { %v1777_v26 = vld [vmem:[%s2749_s0 + $0x38] sm:$0xff]   ;;  %v1410_v27 = vld [vmem:[%s631_s30] ss:$0 sm:$0xff]  ;;  %v1780_v54 = vld [vmem:[#allocation13 + $0x10] sm:$0xff]   ;;  %s3105_s8 = smov (!%p641_p11, %s640_s8), 1  ;;  %p646_p3 = scmp.lt.s32.totalorder %s645_s27, 1 }
 0x13c   : > { %1509 = vmatpush3.bf16.msra.mxu0 %v1754_v3  ;;  %1529 = vmatpush3.bf16.msra.mxu1 %v1765_v8  ;;  %v1781_v55 = vld [vmem:[#allocation13 + $0x18] sm:$0xff]   ;;  %v1784_v58 = vld [vmem:[#allocation13 + $0x30] sm:$0xff]   ;;  %s643_s1 = scalar_lea.vmem %s3065_s13, %s3105_s8  ;;  %s3067_s24 = sld [smem:[#allocation35_spill]] }
 0x13d   : > { %1510 = vmatprep.subr.bf16.mxu0 %v2149_v0  ;;  %1530 = vmatprep.subr.bf16.mxu1 %v2149_v0  ;;  %v1785_v59 = vld [vmem:[#allocation13 + $0x38] sm:$0xff]   ;;  %s3107_s27 = smov (!%p646_p3, %s645_s27), 1  ;;  %s624_s30 = scalar_lea.vmem [#allocation15], %s2727_s25 }
 0x13e   : > { %s648_s3 = scalar_lea.vmem %s3066_s5, %s3107_s27  ;;  %s1165_s27 = scalar_lea.sflag [#allocation6], %s2724_s10 }
 0x13f   : > { %s2151_s20 = smov [#allocation15]  }
 0x140   : > { %1511 = vmatpush3.bf16.msra.mxu0 %v1755_v5  ;;  %1531 = vmatpush3.bf16.msra.mxu1 %v1767_v10  ;;  %p636_p5 = scmp.lt.s32.totalorder %s635_s9, 1  ;;  %s1982_s23 = sshll.u32 %s2151_s20, 4  ;;  %s1983_s23 = int_to_ptr.vmem [resolvable:$false] %s1982_s23 }
 0x141   : > { %1512 = vmatprep.subr.bf16.mxu0 %v2149_v0  ;;  %1532 = vmatprep.subr.bf16.mxu1 %v2149_v0  ;;  %s1984_s0 = scalar_lea.vmem %s1983_s23, 256 }
 0x142   : > { %s3103_s9 = smov (!%p636_p5, %s635_s9), 1  ;;  %p3069_p7 = scmp.ne.s32.totalorder %s3067_s24, 0 }
 0x143   : > { %s638_s26 = scalar_lea.vmem %s3064_s7, %s3103_s9  ;;  %s1178_s9 = sshll.u32 %s624_s30, 4  ;;  %s2858_s9 = int_to_ptr.vmem [resolvable:$true] %s1178_s9 }
 0x144   : > { %1513 = vmatpush3.bf16.msra.mxu0 %v1756_v7  ;;  %1533 = vmatpush3.bf16.msra.mxu1 %v1769_v12  ;;  %v1437_v42 = vld [vmem:[%s638_s26] ss:$0 sm:$0xff]  ;;  %s3068_s26 = sld [smem:[#allocation51_spill]]  ;;  %s1978_s25 = scalar_lea.vmem %s2858_s9, 128 }
 0x145   : > { %1514 = vmatprep.subr.bf16.mxu0 %v2149_v0  ;;  %1534 = vmatprep.subr.bf16.mxu1 %v2149_v0  ;;  %v1438_v12 = vld [vmem:[%s643_s1] ss:$0 sm:$0xff]  ;;  %p1979_p8 = scmp.ne.s32.totalorder %s2858_s9, %s1978_s25  ;;  %p1985_p10 = scmp.lt.s32.totalorder %s2858_s9, %s1983_s23 }
 0x146   : > { %p1986_p4 = scmp.lt.s32.totalorder %s1984_s0, %s1978_s25 }
 0x147   : > { %p1980_p9 = pnand %p1979_p8, %p3069_p7 }
 0x148   : > { %1515 = vmatpush3.bf16.msra.mxu0 %v1757_v9  ;;  %1535 = vmatpush3.bf16.msra.mxu1 %v1771_v14  ;;  %p1987_p1 = por %p1986_p4, %p1985_p10 }
 0x149   : > { %1516 = vmatprep.subr.bf16.mxu0 %v2149_v0  ;;  %1536 = vmatprep.subr.bf16.mxu1 %v2149_v0  ;;  %p1981_p13 = pneg %p1980_p9 }
 0x14a   : > { %s2863_s8 = scalar_lea.hbm %s3068_s26, %s1462_s21 }
 0x14b   : > { %p1988_p12 = pnand %p1987_p1, %p1981_p13 }
 0x14c   : > { %1517 = vmatpush3.bf16.msra.mxu0 %v1758_v11  ;;  %1537 = vmatpush3.bf16.msra.mxu1 %v1773_v17  ;;  %v1439_v17 = vld [vmem:[%s648_s3] ss:$0 sm:$0xff] }
 0x14d   : > { %1518 = vmatprep.subr.bf16.mxu0 %v2149_v0  ;;  %1538 = vmatprep.subr.bf16.mxu1 %v2149_v0 }
 0x150   : > { %1519 = vmatpush3.bf16.msra.mxu0 %v1759_v13  ;;  %1539 = vmatpush3.bf16.msra.mxu1 %v1775_v24 }
 0x151   : > { %1544 = vmatprep.subr.bf16.mxu0 %v2149_v0  ;;  %1564 = vmatprep.subr.bf16.mxu1 %v2149_v0 }
 0x153   : > { %1521 = vmatmul.mubr.bf16.vlgmr.msra.gmra.mrb[0].mxu0 %v1760_v15  ;;  %1541 = vmatmul.mubr.bf16.vlgmr.msra.gmra.mrb[0].mxu1 %v1776_v25 }
 0x154   : > { %1545 = vmatpush3.bf16.msra.mxu0 %v1762_v16  ;;  %1560 = vmatprep.mubr.msk.bf16.mxu0 %vm2150_vm0, %v2149_v0 }
 0x155   : > { %1546 = vmatprep.subr.bf16.mxu0 %v2149_v0  ;;  %1580 = vmatprep.mubr.msk.bf16.mxu1 %vm2150_vm0, %v2149_v0 }
 0x156   : > { %1565 = vmatpush3.bf16.msra.mxu1 %v1778_v52 }
 0x157   : > { %1566 = vmatprep.subr.bf16.mxu1 %v2149_v0 }
 0x158   : > { %1547 = vmatpush3.bf16.msra.mxu0 %v1764_v18 }
 0x159   : > { %1548 = vmatprep.subr.bf16.mxu0 %v2149_v0 }
 0x15a   : > { %1567 = vmatpush3.bf16.msra.mxu1 %v1779_v53 }
 0x15b   : > { %1568 = vmatprep.subr.bf16.mxu1 %v2149_v0 }
 0x15c   : > { %1549 = vmatpush3.bf16.msra.mxu0 %v1766_v19 }
 0x15d   : > { %1550 = vmatprep.subr.bf16.mxu0 %v2149_v0 }
 0x15e   : > { %1569 = vmatpush3.bf16.msra.mxu1 %v1780_v54 }
 0x15f   : > { %1570 = vmatprep.subr.bf16.mxu1 %v2149_v0 }
 0x160   : > { %1551 = vmatpush3.bf16.msra.mxu0 %v1768_v20 }
 0x161   : > { %1552 = vmatprep.subr.bf16.mxu0 %v2149_v0 }
 0x162   : > { %1571 = vmatpush3.bf16.msra.mxu1 %v1781_v55 }
 0x163   : > { %1572 = vmatprep.subr.bf16.mxu1 %v2149_v0 }
 0x164   : > { %1553 = vmatpush3.bf16.msra.mxu0 %v1770_v21 }
 0x165   : > { %1554 = vmatprep.subr.bf16.mxu0 %v2149_v0 }
 0x166   : > { %1573 = vmatpush3.bf16.msra.mxu1 %v1782_v56 }
 0x167   : > { %1574 = vmatprep.subr.bf16.mxu1 %v2149_v0 }
 0x168   : > { %1555 = vmatpush3.bf16.msra.mxu0 %v1772_v22 }
 0x169   : > { %1556 = vmatprep.subr.bf16.mxu0 %v2149_v0 }
 0x16a   : > { %1575 = vmatpush3.bf16.msra.mxu1 %v1783_v57 }
 0x16b   : > { %1576 = vmatprep.subr.bf16.mxu1 %v2149_v0 }
 0x16c   : > { %1557 = vmatpush3.bf16.msra.mxu0 %v1774_v23 }
 0x16d   : > { %1558 = vmatprep.subr.bf16.mxu0 %v2149_v0 }
 0x16e   : > { %1577 = vmatpush3.bf16.msra.mxu1 %v1784_v58 }
 0x16f   : > { %1578 = vmatprep.subr.bf16.mxu1 %v2149_v0 }
 0x170   : > { %1559 = vmatpush3.bf16.msra.mxu0 %v1777_v26 }
 0x172   : > { %1579 = vmatpush3.bf16.msra.mxu1 %v1785_v59 }
 0x226   : > { %v765_v28 = vpop.f32.mrb[0].mxu0  ;;  %v897_v37 = vpop.f32.mrb[0].mxu1 }
 0x227   : > { %v766_v29 = vadd.f32 %v1410_v27, %v765_v28  ;;  %v1522_v30 = vpop.f32.mrb[1].mxu0  ;;  %v1542_v38 = vpop.f32.mrb[1].mxu1 }
 0x228   : > { %v768_v31 = vpop.f32.mrb[2].mxu0  ;;  %v900_v39 = vpop.f32.mrb[2].mxu1 }
 0x229   : > { %v769_v32 = vadd.f32 %v1410_v27, %v768_v31  ;;  %v1523_v33 = vpop.f32.mrb[3].mxu0  ;;  %v772_v34 = vmax.f32 %v766_v29, 0.0  ;;  %v1543_v40 = vpop.f32.mrb[3].mxu1 }
 0x22b   : > { %v773_v35 = vmax.f32 %v769_v32, 0.0 }
 0x22d   : > { %v774_v36 = vpack.c.bf16 %v773_v35, %v772_v34 }
 0x22f   : > { %1561 = vmatmul.mubr.bf16.vlgmr.msra.gmra.mrb[4].mxu0 %v774_v36 }
 0x302   : > { %v986_v41 = vpop.f32.mrb[4].mxu0 }
 0x303   : > { %v987_v43 = vadd.f32 %v986_v41, %v897_v37  ;;  %v1562_v44 = vpop.f32.mrb[5].mxu0 }
 0x304   : > { %v989_v45 = vpop.f32.mrb[6].mxu0 }
 0x305   : > { %v1000_v46 = vadd.f32 %v1437_v42, %v987_v43  ;;  %v990_v47 = vadd.f32 %v989_v45, %v900_v39  ;;  %v1563_v48 = vpop.f32.mrb[7].mxu0 }
 0x307   : > { %v2835_v49 = vadd.f32 %v1437_v42, %v990_v47  ;;  %1002 = vadd.xlane.f32.xlu0 %v1000_v46  ;;  %v1008_v50 = vmul.f32 %v1000_v46, %v1000_v46 }
 0x309   : > { %1010 = vadd.xlane.f32.xlu1 %v1008_v50  ;;  %v1009_v51 = vmul.f32 %v2835_v49, %v2835_v49 }
 0x30b   : > { %1004 = vadd.xlane.f32.xlu0 %v2835_v49 }
 0x30d   : > { %1012 = vadd.xlane.f32.xlu1 %v1009_v51 }
 0x394   : > { %v1003_v60 = vpop.xlane.xlu0 %1002 }
 0x395   : > { %v1006_v61 = vmul.f32 0.03125, %v1003_v60 }
 0x396   : > { %v1011_v62 = vpop.xlane.xlu1 %1010 }
 0x397   : > { %v1016_v63 = vmul.f32 %v1006_v61, %v1006_v61  ;;  %v1014_v1 = vmul.f32 0.03125, %v1011_v62  ;;  %v1020_v0 = vsub.f32 %v1000_v46, %v1006_v61 }
 0x398   : > { %v1005_v2 = vpop.xlane.xlu0 %1004 }
 0x399   : > { %v1018_v3 = vsub.f32 %v1014_v1, %v1016_v63  ;;  %v1007_v4 = vmul.f32 0.03125, %v1005_v2 }
 0x39a   : > { %v1013_v5 = vpop.xlane.xlu1 %1012 }
 0x39b   : > { %v1022_v6 = vadd.f32 1e-05, %v1018_v3  ;;  %v1017_v7 = vmul.f32 %v1007_v4, %v1007_v4  ;;  %v1015_v8 = vmul.f32 0.03125, %v1013_v5  ;;  %v1021_v14 = vsub.f32 %v2835_v49, %v1007_v4 }
 0x39d   : > { %1786 = vrsqrt.f32 %v1022_v6  ;;  %v1019_v9 = vsub.f32 %v1015_v8, %v1017_v7 }
 0x39f   : > { %v1023_v10 = vadd.f32 1e-05, %v1019_v9 }
 0x3a1   : > { %1788 = vrsqrt.f32 %v1023_v10 }
 0x3a7   : > { %v1787_v11 = vpop.eup %1786 }
 0x3a8   : > { %v1026_v13 = vmul.f32 %v1787_v11, %v1020_v0 }
 0x3aa   : > { %v1035_v15 = vmul.f32 %v1438_v12, %v1026_v13 }
 0x3ab   : > { %v1789_v16 = vpop.eup %1788 }
 0x3ac   : > { %v1027_v18 = vmul.f32 %v1789_v16, %v1021_v14  ;;  %v1044_v20 = vadd.f32 %v1439_v17, %v1035_v15 }
 0x3ae   : > { %v1036_v19 = vmul.f32 %v1438_v12, %v1027_v18  ;;  %v1046_v22 = vmax.f32 %v1044_v20, 0.0 }
 0x3b0   : > { %v1045_v21 = vadd.f32 %v1439_v17, %v1036_v19 }
 0x3b2   : > { %v1047_v23 = vmax.f32 %v1045_v21, 0.0 }
 0x3b4   : > { %v1048_v24 = vpack.c.bf16 %v1047_v23, %v1046_v22 }
 0x3b6   : > { %1581 = vmatmul.mubr.bf16.vlgmr.msra.gmra.mrb[4].mxu1 %v1048_v24 }
 0x489   : > { %v1147_v25 = vpop.f32.mrb[4].mxu1 }
 0x48a   : > { %v1582_v26 = vpop.f32.mrb[5].mxu1 }
 0x48b   : > { %v1150_v27 = vpop.f32.mrb[6].mxu1 }
 0x48c   : > { %v1466_v28 = vpack.c.bf16 %v1150_v27, %v1147_v25  ;;  %v1583_v29 = vpop.f32.mrb[7].mxu1 }
 0x48e   : > { %1467 = vst [vmem:[%s624_s30] sm:$0xff] %v1466_v28  }
 0x48f   : > { %1991 = shalt.err (!%p1988_p12)
}
 0x490   : > { %s1992_s13 = scalar_lea.hbm %s2863_s8, 128  ;;  %s1996_s16 = scalar_lea.hbm %s3068_s26, 256 }
 0x491   : > { %p1993_p2 = scmp.ne.s32.totalorder %s2863_s8, %s1992_s13  ;;  %p1997_p5 = scmp.lt.u32.totalorder %s2863_s8, %s3068_s26 }
 0x492   : > { %p1998_p11 = scmp.lt.u32.totalorder %s1996_s16, %s1992_s13  ;;  %p2000_p8 = scmp.lt.u32.totalorder %s1992_s13, %s2863_s8 }
 0x493   : > { %p1994_p0 = pnand %p1993_p2, %p3069_p7 }
 0x494   : > { %p1999_p3 = por %p1998_p11, %p1997_p5 }
 0x495   : > { %p1995_p6 = pneg %p1994_p0 }
 0x496   : > { %p2001_p9 = por %p2000_p8, %p1999_p3 }
 0x498   : > { %p2002_p13 = pnand %p2001_p9, %p1995_p6 }
 0x49a   : > { %2005 = shalt.err (!%p2002_p13)
}
 0x49b   : > { %s2152_s30 = smov 64   ;;  %s2153_s21 = smov 4  }
 0x49c   : > { %1604 = dma.vmem_to_hbm [thread:$0]  (%p3069_p7), %s2858_s9, 128, %s2863_s8, %s1165_s27, %s2152_s30, %s2152_s30, %s2153_s21  }
 0x49d PF: > { %s3070_s2 = sld [smem:[#allocation33_spill]]  ;;  %s3071_s7 = sld [smem:[#allocation36_spill]] }
 0x49e   : > { %p3073_p4 = scmp.ge.s32.totalorder %s2138_s19, 2 }
 0x4a3   : > { %s1193_s25 = sand.u32 1, %s3070_s2   ;;  %p3072_p10 = scmp.ne.s32.totalorder %s3071_s7, 0 }
 0x4a4   : > { %s1194_s20 = scalar_lea.sflag [#allocation6], %s1193_s25 }
 0x4a5   : > { %p1633_p1 = pnand %p3073_p4, %p3072_p10 }
 0x4a7   : > { %2085 = dma.done.wait (!%p1633_p1), %s1194_s20, 128  }
 0x4a8   : > { %2087 = vsyncadd (!%p1633_p1), %s1194_s20, 4294967168  ;;  %s3074_s30 = sld [smem:[#allocation31_spill]]  ;;  %s3075_s0 = sld [smem:[#allocation32_spill]] }
 0x4a9   : > { %s3076_s12 = sld [smem:[#allocation38_spill]]  ;;  %s3077_s10 = sld [smem:[#allocation34_spill]] }
 0x4aa   : > { %p35_p7 = scmp.ge.s32.totalorder %s2296_s22, 4   ;;  %s3078_s27 = smov %s2094_s28 }
 0x4ab   : > { %s3079_s28 = smov %s2098_s29  ;;  %s3080_s29 = smov %s2668_s11 }
 0x4ac   : > { %s3081_s13 = smov %s2118_s14  ;;  %s3082_s14 = smov %s2122_s15 }
 0x4ad   : > { %s3083_s15 = smov %s2584_s6  ;;  %s3084_s16 = smov %s2130_s17 }
 0x4ae   : > { %s3085_s17 = smov %s2134_s18  ;;  %s3087_s19 = smov %s2296_s22 }
 0x4af   : > { %s3086_s18 = smov %s3077_s10  ;;  %37 = sbr.rel (!%p35_p7) target bundleno = 33 (0x21), region = 169 }
 0x4b6   :  { %1199 = vsyncpa [#allocation5], 1 }
 0x4b7   :  { %1201 = vsyncpa [#allocation5 + $0x1], 1 }
 0x4b8   :  { %1202 = vsyncpa [#allocation8], 1 }
 0x4b9   :  { %1204 = vsyncpa [#allocation8 + $0x1], 1 }
 0x4ba   :  { %1205 = vsyncpa [#allocation11], 1 }
 0x4bb   :  { %1207 = vsyncpa [#allocation11 + $0x1], 1 }
 0x4bc   :  { %1208 = vsyncpa [#allocation14], 1 }
 0x4bd   :  { %1209 = vsyncpa [#allocation6], 1 }
 0x4be   :  { %1211 = vsyncpa [#allocation6 + $0x1], 1 }

</bundles_post_ra>
